<compile_context>
chip_gen: v7x
topology: tpu7x:2x2x1
jax: 0.10.0
libtpu: 0.0.40
codegen_flags: <defaults>
</compile_context>

<pallas_src>
import functools

import jax
import jax.numpy as jnp
from jax.experimental import pallas as pl
from jax.experimental.pallas import tpu as pltpu


def _gp_partial_kernel(g_ref, o_ref, *scratch, n_lane_chunks, rem):
    """Per-row sum of squares, streamed over the lane (reduction) grid axis.

    g_ref:   (Rb, tn)  current lane chunk of the reshaped gradient (native dtype)
    o_ref:   (Rb, 1)   f32 per-row sum of squares (written on last lane chunk)
    scratch: optional (Rb, tn) f32 lane-wide accumulator (only if >1 lane chunk)
    """

    def sq(mask_tail):
        g = g_ref[...].astype(jnp.float32)
        if mask_tail:  # static: only the final, ragged lane chunk pays the mask
            lane = jax.lax.broadcasted_iota(jnp.int32, g.shape, 1)
            g = jnp.where(lane < rem, g, 0.0)
        return g * g

    if n_lane_chunks == 1:
        # Single chunk per row block: no accumulator, write the reduce directly.
        o_ref[...] = jnp.sum(sq(rem != 0), axis=1, keepdims=True)
        return

    (acc_ref,) = scratch
    k = pl.program_id(1)
    last = n_lane_chunks - 1

    @pl.when(k == 0)
    def _():
        # Initialize with the first chunk's contribution (no zero-fill pass).
        acc_ref[...] = sq(False)

    if rem:
        @pl.when(jnp.logical_and(k > 0, k < last))
        def _():
            acc_ref[...] += sq(False)      # unmasked steady state

        @pl.when(k == last)
        def _():
            acc_ref[...] += sq(True)       # mask only the ragged tail chunk
            o_ref[...] = jnp.sum(acc_ref[...], axis=1, keepdims=True)
    else:
        @pl.when(k > 0)
        def _():
            acc_ref[...] += sq(False)

        @pl.when(k == last)
        def _():
            # Single cross-lane reduce + single narrow (Rb, 1) store per row block.
            o_ref[...] = jnp.sum(acc_ref[...], axis=1, keepdims=True)


def _choose_split(B, N, itemsize):
    """Pick S (a divisor of N) so the free row-major reshape (B, N) -> (B*S, N//S)
    gives a sublane-dense, lane-dense slab with a moderate row count."""
    pack = {4: 8, 2: 16, 1: 32}.get(itemsize, 8)
    best_s, best_key = 1, None
    for s in range(1, min(N, 8192) + 1):
        if N % s:
            continue
        R, M = B * s, N // s
        key = (
            R % pack == 0,            # full sublane packing for this dtype
            M >= 128,                 # lane-dense blocks possible
            R % (2 * pack) == 0,      # allows a 2-way row split (v7x megacore)
            -abs(R - 128),            # keep row count moderate
        )
        if best_key is None or key > best_key:
            best_key, best_s = key, s
    return best_s, pack


def _choose_tn(M, lanes_budget):
    """Lane-chunk width <= lanes_budget.  Prefer a 128-aligned divisor of M near
    the budget (rem == 0 -> no mask anywhere); else a 128-aligned chunk."""
    if M <= lanes_budget:
        return M
    best = 0
    i = 1
    while i * i <= M:
        if M % i == 0:
            for cand in (i, M // i):
                if cand <= lanes_budget and cand % 128 == 0 and cand > best:
                    best = cand
        i += 1
    floor_aligned = max(128, (lanes_budget // 128) * 128)
    if best >= max(128, floor_aligned // 2):
        return best                   # divisor close enough to the budget
    return floor_aligned              # ragged tail, masked only on the last chunk


def _tpu_block_plan():
    """Per-generation (target input-block bytes, vmem_limit_bytes)."""
    kind = ""
    try:
        dev = jax.devices()[0]
        if dev.platform == "tpu":
            kind = dev.device_kind.lower()
    except Exception:
        pass
    if "v7" in kind or "tpu7" in kind:
        # v7x: ~3.2 TB/s HBM per TC makes per-step overhead dominant at small
        # blocks; 8 MiB steps. 64 MiB physical VMEM per TC -> 48 MiB limit.
        return 8 << 20, 48 << 20
    if "v6" in kind:
        # v6e: ~1.4 TB/s; 8 MiB steps reach ~95% of roofline. 128 MiB physical.
        return 8 << 20, 64 << 20
    # v5e / unknown: ~0.82 TB/s already hides step overhead near 4 MiB; a
    # 32 MiB limit is safe on every generation's physical VMEM.
    return 4 << 20, 32 << 20


def gradient_penalty_from_grads(grad_interp_flat, *, force_pallas=False,
                                min_pallas_bytes=4 << 20):
    """grad_interp_flat: (B, N) flattened gradients (native dtype); returns scalar
    f32 loss = mean((||g_b||_2 - 1)^2)."""
    B, N = grad_interp_flat.shape
    itemsize = jnp.dtype(grad_interp_flat.dtype).itemsize

    # Small-input fallback: a fused XLA reduction beats pallas_call launch cost.
    if not force_pallas and B * N * itemsize < min_pallas_bytes:
        g = grad_interp_flat.astype(jnp.float32)
        norms = jnp.sqrt(jnp.sum(g * g, axis=1))
        return jnp.mean((norms - 1.0) ** 2)

    target_block_bytes, vmem_limit = _tpu_block_plan()

    s, pack = _choose_split(B, N, itemsize)
    R, M = B * s, N // s
    g2 = grad_interp_flat.reshape(R, M)  # row-major contiguous -> free reshape

    # Row-block split: 2 "parallel" blocks so a 2-TC part can stream half each.
    n_row_blocks = 2 if (R % (2 * pack) == 0 and R >= 2 * pack) else 1
    rb = R // n_row_blocks

    # Lane chunk sized to the per-step byte budget (HBM-streaming => big blocks),
    # shrunk if the live VMEM set (2x input dbuf + f32 lane-wide acc) won't fit.
    lanes_budget = max(128, target_block_bytes // max(1, rb * itemsize))
    tn = _choose_tn(M, lanes_budget)

    def live_bytes(t):
        acc = rb * t * 4 if int(pl.cdiv(M, t)) > 1 else 0
        return 2 * rb * t * itemsize + acc + 2 * rb * 4 + (256 << 10)

    while tn > 128 and live_bytes(tn) > vmem_limit:
        tn = _choose_tn(M, max(128, tn // 2))

    n_lane_chunks = int(pl.cdiv(M, tn))
    rem = M % tn

    kernel = functools.partial(
        _gp_partial_kernel, n_lane_chunks=n_lane_chunks, rem=rem
    )
    scratch = [pltpu.VMEM((rb, tn), jnp.float32)] if n_lane_chunks > 1 else []

    row_ss = pl.pallas_call(
        kernel,
        out_shape=jax.ShapeDtypeStruct((R, 1), jnp.float32),
        grid_spec=pltpu.PrefetchScalarGridSpec(
            num_scalar_prefetch=0,
            grid=(n_row_blocks, n_lane_chunks),
            in_specs=[pl.BlockSpec((rb, tn), lambda i, k: (i, k))],
            out_specs=pl.BlockSpec((rb, 1), lambda i, k: (i, 0)),
            scratch_shapes=scratch,
        ),
        compiler_params=pltpu.CompilerParams(
            # TODO(synk): on v7x, if xprof shows one idle TensorCore, switch the
            # leading axis to pltpu.CORE_PARALLEL (or split via pl.core_map);
            # plain "parallel" is kept here because it is safe on all gens.
            dimension_semantics=("parallel", "arbitrary"),
            vmem_limit_bytes=int(vmem_limit),
        ),
    )(g2)

    # Tiny O(B) epilogue in plain JAX: fold the S row-partials back per batch row,
    # then norm / (norm - 1)^2 / mean.
    per_batch_ss = jnp.sum(row_ss.reshape(B, s), axis=1)
    norms = jnp.sqrt(per_batch_ss)               # == grad_interp.norm(2, dim=1)
    return jnp.mean((norms - 1.0) ** 2)


def gradient_penalty_loss(critic_fn, interp, *, force_pallas=False):
    """Full GradientPenaltyLoss.forward equivalent.

    critic_fn: interp -> interp_crit (the graph connecting the two inputs of the
               PyTorch forward; required to take the gradient in JAX).
    """
    # TODO(synk): torch.autograd.grad over an externally-built graph has no Pallas
    # equivalent; the differentiation itself is plain-JAX vjp with ones cotangent.
    interp_crit, vjp_fn = jax.vjp(critic_fn, interp)
    grad_outputs = jnp.ones_like(interp_crit)      # get_grad_outputs(interp_crit)
    (grad_interp,) = vjp_fn(grad_outputs)          # autograd.grad(..., grad_outputs=ones)
    B = grad_interp.shape[0]
    grad_interp_flat = grad_interp.reshape(B, -1)  # .view(B, -1)
    return gradient_penalty_from_grads(grad_interp_flat, force_pallas=force_pallas)


if __name__ == "__main__":
    key = jax.random.PRNGKey(0)
    k_x, k_w = jax.random.split(key)

    B, C, H, W = 2, 4, 16, 16            # interp: NCHW, same as PyTorch
    interp = jax.random.normal(k_x, (B, C, H, W), dtype=jnp.float32)

    # Synthetic deterministic critic: per-channel weighted tanh, reduced to a
    # per-sample scalar (stands in for the discriminator output).
    w_c = jax.random.normal(k_w, (C,), dtype=jnp.float32)

    def critic_fn(x):
        # x: (B, C, H, W) -> (B,)
        return jnp.einsum("bchw,c->b", jnp.tanh(x), w_c) / (H * W)

    # Force the Pallas path at this tiny demo size so the kernel is actually
    # compiled and executed (production-sized gradients take it automatically).
    loss = jax.jit(
        functools.partial(gradient_penalty_loss, critic_fn, force_pallas=True)
    )(interp)
    loss = jax.block_until_ready(loss)

    # Also exercise the small-input XLA fallback path.
    loss_fb = jax.block_until_ready(
        jax.jit(functools.partial(gradient_penalty_loss, critic_fn))(interp)
    )

    # Pure-JAX reference for a sanity check.
    _, vjp_fn = jax.vjp(critic_fn, interp)
    (g_ref,) = vjp_fn(jnp.ones((B,), jnp.float32))
    norms_ref = jnp.linalg.norm(g_ref.reshape(B, -1), axis=1)
    loss_ref = jnp.mean((norms_ref - 1.0) ** 2)

    assert jnp.allclose(loss, loss_ref, rtol=1e-5, atol=1e-6), (loss, loss_ref)
    assert jnp.allclose(loss_fb, loss_ref, rtol=1e-5, atol=1e-6), (loss_fb, loss_ref)

    print("KERNEL_OK")
</pallas_src>

<mosaic_0001>
module attributes {stable_mosaic.version = 11 : i64} {
  func.func @_gp_partial_kernel(%arg0: i32, %arg1: i32, %arg2: memref<8x128xf32, #tpu.memory_space<vmem>>, %arg3: memref<8x1xf32, #tpu.memory_space<vmem>>) attributes {dimension_semantics = [#tpu.dimension_semantics<parallel>, #tpu.dimension_semantics<arbitrary>], iteration_bounds = array<i64: 2, 1>, scalar_prefetch = 0 : i64, scratch_operands = 0 : i64, tpu.core_type = #tpu.core_type<tc>, window_params = [{transform_indices = @transform_0, window_bounds = array<i64: 8, 128>}, {transform_indices = @transform_1, window_bounds = array<i64: 8, 1>}]} {
    %c0 = arith.constant 0 : index
    %c0_0 = arith.constant 0 : index
    %0 = vector.load %arg2[%c0, %c0_0] : memref<8x128xf32, #tpu.memory_space<vmem>>, vector<8x128xf32>
    %1 = arith.mulf %0, %0 : vector<8x128xf32>
    %cst = arith.constant dense<0.000000e+00> : vector<8xf32>
    %2 = vector.multi_reduction <add>, %1, %cst [1] : vector<8x128xf32> to vector<8xf32>
    %3 = vector.shape_cast %2 : vector<8xf32> to vector<8x1xf32>
    %c0_1 = arith.constant 0 : index
    %c0_2 = arith.constant 0 : index
    %4 = vector.load %arg3[%c0_1, %c0_2] : memref<8x1xf32, #tpu.memory_space<vmem>>, vector<8x1xf32>
    tpu.vector_store %arg3[%c0_1, %c0_2], %3 {strides = array<i32>} : memref<8x1xf32, #tpu.memory_space<vmem>>, vector<8x1xf32>,
    return
  }
  func.func @transform_0(%arg0: i32, %arg1: i32) -> (i32, i32) {
    %c0_i32 = arith.constant 0 : i32
    return %arg0, %arg1 : i32, i32
  }
  func.func @transform_1(%arg0: i32, %arg1: i32) -> (i32, i32) {
    %c0_i32 = arith.constant 0 : i32
    %c0_i32_0 = arith.constant 0 : i32
    return %arg0, %c0_i32 : i32, i32
  }
}

</mosaic_0001>

<bundles_post_ra>
// kernel: gradient_penalty_loss.1
= control target key start
LH: loop header
LB: loop body
LE: loop exit
PB: predicated region body
PF: predicated region fallthrough
CT: control target
= control target key end

     0   :  { %s272_s6 = smov 0   ;;  %s274_s7 = smov 0   ;;  %s293_s0 = inlined_call_operand.vmem [shape: f32[16,128], index: 0, kind: input, shape index: {}]   ;;  %s294_s1 = inlined_call_operand.vmem [shape: f32[16,1], index: 1, kind: output, shape index: {}]  }
   0x1   :  { %s276_s8 = smov 0  }
   0x2 LB: > { %s23_s9 = sadd.s32 1, %s256_s7  ;;  %p209_p0 = scmp.ge.s32.totalorder %s260_s8, 1  ;;  %s260_s8 = sphi %s276_s8, %s11_s8   ;;  %s256_s7 = sphi %s274_s7, %s296_s7   ;;  %s252_s6 = sphi %s272_s6, %s295_s6  }
   0x3   : > { %p25_p1 = scmp.ge.s32.totalorder %s23_s9, 2  ;;  %p103_p2 = scmp.lt.s32.totalorder %s260_s8, 3 }
   0x5   : > { %s298_s9 = smov (%p25_p1, %s23_s9), 0  ;;  %p104_p3 = pnand %p209_p0, %p103_p2 }
   0x6   : > { %p124_p4 = scmp.lt.s32.totalorder (!%p104_p3), %s252_s6, 1  ;;  %vm139_vm0 = vcmask (!%p104_p3), 7168  }
   0x7   : > { %107 = sbr.rel (%p104_p3) target bundleno = 163 (0xa3), region = 24 }
   0xe   : > { %s300_s6 = smov (!%p124_p4, %s252_s6), 1 }
   0xf   : > { %s210_s10 = sshll.u32 %s300_s6, 3 }
  0x10   : > { %s130_s13 = scalar_lea.vmem %s293_s0, %s210_s10  ;;  %s134_s16 = scalar_lea.vmem %s294_s1, %s210_s10 }
  0x11   : > { %v135_v0 = vld [vmem:[%s130_s13] sm:$0xff] }
  0x12   : > { %v136_v1 = vmul.f32 %v135_v0, %v135_v0 }
  0x14   : > { %137 = vadd.xlane.f32.xlu0 %v136_v1 }
  0xa1   : > { %v138_v2 = vpop.xlane.xlu0 %137 }
  0xa2   : > { %140 = vst.msk [vmem:[%s134_s16] sm:$0xff] %vm139_vm0, %v138_v2 }
  0xa3 PF: > { %s11_s8 = sadd.s32 1, %s260_s8   ;;  %s295_s6 = smov %s256_s7 }
  0xa4   : > { %p8_p5 = scmp.ge.s32.totalorder %s11_s8, 4   ;;  %s296_s7 = smov %s298_s9 }
  0xa6   :  { %10 = sbr.rel (!%p8_p5) target bundleno = 2 (0x2), region = 54 }

</bundles_post_ra>
